<compile_context>
chip_gen: v7x
topology: tpu7x:2x2x1
jax: 0.10.0
libtpu: 0.0.40
codegen_flags: <defaults>
</compile_context>

<pallas_src>
import functools

import jax
import jax.numpy as jnp
from jax import lax
from jax.experimental import pallas as pl
from jax.experimental.pallas import tpu as pltpu

# Deterministic "module config" (nn.Module __init__ args; no learnable params).
LAMBDA_ = 0.0051
SCALE_LOSS = 0.024
EMBEDDING_DIM = 32
NUM_COPIES = 2
EPS = 1e-5

_LANE = 128
_SUBLANE = 8
_TARGET_BLOCK_BYTES = 4 * 1024 * 1024   # ~4 MiB of input per grid step


def _cdiv(a: int, b: int) -> int:
    return -(-a // b)


def _round_up(a: int, b: int) -> int:
    return _cdiv(a, b) * b


def _stats_kernel(x_ref, vec_ref, cross_ref, vec_acc, cross_acc):
    """Accumulate raw per-feature sums and the raw a^T b cross product."""
    t = pl.program_id(1)

    @pl.when(t == 0)
    def _init():
        vec_acc[...] = jnp.zeros_like(vec_acc)
        cross_acc[...] = jnp.zeros_like(cross_acc)

    a_raw = x_ref[0]                      # (TB, Dp) copy-0 rows, lane packed
    b_raw = x_ref[1]                      # (TB, Dp) copy-1 rows, lane packed
    a = a_raw.astype(jnp.float32)
    b = b_raw.astype(jnp.float32)

    # Lane-dense VPU sublane reductions (full 128-lane vregs).
    vec_acc[0:1, :] += jnp.sum(a, axis=0, keepdims=True)
    vec_acc[1:2, :] += jnp.sum(b, axis=0, keepdims=True)
    vec_acc[2:3, :] += jnp.sum(a * a + b * b, axis=0, keepdims=True)
    # Contract over the batch (sublane) dim on the MXU; raw-dtype operands keep
    # bf16 inputs on the fast MXU path, accumulation is f32.
    cross_acc[...] += lax.dot_general(
        a_raw, b_raw, dimension_numbers=(((0,), (0,)), ((), ())),
        preferred_element_type=jnp.float32)

    @pl.when(t == pl.num_programs(1) - 1)
    def _writeback():
        vec_ref[0] = vec_acc[...]
        cross_ref[0] = cross_acc[...]


def _finalize_kernel(vec_ref, cross_ref, loss_ref, *, d, lane_pack, n_total,
                     lambda_, scale_loss, eps):
    """Combine per-chunk partials and compute the scalar Barlow-Twins loss."""
    vec = jnp.sum(vec_ref[...], axis=0)          # (8, Dp)   rows 0..2 used
    cr = jnp.sum(cross_ref[...], axis=0)         # (Dp, Dp)
    dp = cr.shape[-1]

    # Fold the lane_pack row-groups back onto the true feature dim:
    # sum_x[p] = sum_g vec[g*d + p],  cross[p,q] = sum_g cr[g*d+p, g*d+q]
    # (sum of the lane_pack diagonal d x d blocks), via circular rolls.
    g = lane_pack
    while g > 1:
        shift = (g // 2) * d
        vec = vec + pltpu.roll(vec, shift, axis=1)
        cr = cr + pltpu.roll(pltpu.roll(cr, shift, axis=0), shift, axis=1)
        g //= 2

    lane = lax.broadcasted_iota(jnp.int32, (1, dp), 1)
    feat = lane < d
    sum_a = jnp.where(feat, vec[0:1, :], 0.0)
    sum_b = jnp.where(feat, vec[1:2, :], 0.0)
    sum_sq = jnp.where(feat, vec[2:3, :], 0.0)
    row = lax.broadcasted_iota(jnp.int32, (dp, dp), 0)
    col = lax.broadcasted_iota(jnp.int32, (dp, dp), 1)
    cr = jnp.where((row < d) & (col < d), cr, 0.0)

    n = float(n_total)
    h = float(n_total // 2)
    mu = (sum_a + sum_b) * (1.0 / n)             # per-feature mean   (1, Dp)
    # One-pass biased variance (sum_sq/N - mu^2), matching the reference's
    # batch statistics.  TODO(synk): two-pass/Welford if embeddings carry very
    # large per-feature offsets (cancellation risk).
    var = sum_sq * (1.0 / n) - mu * mu
    r = jnp.where(feat, lax.rsqrt(var + eps), 0.0)

    def outer(u, v):  # (1,Dp) x (1,Dp) -> (Dp,Dp) outer product (K=1 matmul)
        return lax.dot_general(u, v, dimension_numbers=(((0,), (0,)), ((), ())),
                               preferred_element_type=jnp.float32)

    # corr_pq = r_p r_q (cross_pq - Sa_p mu_q - mu_p Sb_q + H mu_p mu_q) / H
    adjusted = cr - outer(sum_a, mu) - outer(mu, sum_b) + h * outer(mu, mu)
    corr = outer(r, r) * adjusted * (1.0 / h)    # zero outside top-left d x d

    eye = (row == col) & (row < d)
    diag_dev = jnp.where(eye, corr - 1.0, 0.0)
    off_v = jnp.where(eye, 0.0, corr)            # corr already 0 outside block
    on_diag = jnp.sum(diag_dev * diag_dev)
    off_diag = jnp.sum(off_v * off_v)
    loss_ref[0, 0] = scale_loss * (on_diag + lambda_ * off_diag)


def barlow_twins_head(embedding: jax.Array,
                      lambda_: float = LAMBDA_,
                      scale_loss: float = SCALE_LOSS,
                      embedding_dim: int = EMBEDDING_DIM,
                      eps: float = EPS,
                      max_block_rows=None) -> jax.Array:
    assert embedding.ndim == 2 and embedding.shape[1] == embedding_dim, (
        f"Incorrect embedding shape: {embedding.shape}, expected Nx{embedding_dim}")
    n, d = embedding.shape
    assert n % NUM_COPIES == 0, (
        f"Batch size {n} should be divisible by num_copies ({NUM_COPIES}).")
    half = n // NUM_COPIES

    # Lane packing: put `lane_pack` consecutive rows on the 128-lane axis so
    # DMA rows / vregs are lane dense (128 % d == 0 => lane_pack is a pow2).
    lane_pack = _LANE // d if (d < _LANE and _LANE % d == 0) else 1
    dp = d * lane_pack
    itemsize = jnp.dtype(embedding.dtype).itemsize

    rows_needed = _cdiv(half, lane_pack)         # packed rows per half
    # Two independent chunks => leading "parallel" grid axis (v7x megacore).
    num_chunks = 2 if rows_needed >= 2 * _SUBLANE else 1
    if max_block_rows is None:
        tile_cap = max(_SUBLANE,
                       (_TARGET_BLOCK_BYTES // (NUM_COPIES * dp * itemsize))
                       // _SUBLANE * _SUBLANE)
    else:
        tile_cap = max(_SUBLANE, (int(max_block_rows) // _SUBLANE) * _SUBLANE)
    steps_per_chunk = max(1, _cdiv(rows_needed, num_chunks * tile_cap))
    tile_rows = _round_up(_cdiv(rows_needed, num_chunks * steps_per_chunk),
                          _SUBLANE)
    padded_rows = num_chunks * steps_per_chunk * tile_rows
    padded_half = padded_rows * lane_pack

    pairs = embedding.reshape(NUM_COPIES, half, d)       # free row-major view
    if padded_half > half:
        # Zero rows add nothing to sum / sum_sq / cross; n_total is passed
        # explicitly so the normalization stays exact.
        pairs = jnp.pad(pairs, ((0, 0), (0, padded_half - half), (0, 0)))
    packed = pairs.reshape(NUM_COPIES, padded_rows, dp)  # free view

    flops = 2 * padded_rows * dp * dp
    bytes_accessed = (NUM_COPIES * padded_rows * dp * itemsize
                      + num_chunks * (8 + dp) * dp * 4)

    vec_stats, cross = pl.pallas_call(
        _stats_kernel,
        out_shape=(jax.ShapeDtypeStruct((num_chunks, 8, dp), jnp.float32),
                   jax.ShapeDtypeStruct((num_chunks, dp, dp), jnp.float32)),
        grid=(num_chunks, steps_per_chunk),
        in_specs=[pl.BlockSpec(
            (NUM_COPIES, tile_rows, dp),
            lambda c, t: (0, c * steps_per_chunk + t, 0))],
        out_specs=(pl.BlockSpec((1, 8, dp), lambda c, t: (c, 0, 0)),
                   pl.BlockSpec((1, dp, dp), lambda c, t: (c, 0, 0))),
        scratch_shapes=[pltpu.VMEM((8, dp), jnp.float32),
                        pltpu.VMEM((dp, dp), jnp.float32)],
        compiler_params=pltpu.CompilerParams(
            dimension_semantics=("parallel", "arbitrary"),
            vmem_limit_bytes=32 * 1024 * 1024),
        cost_estimate=pl.CostEstimate(flops=flops, transcendentals=0,
                                      bytes_accessed=bytes_accessed),
    )(packed)

    finalize = functools.partial(
        _finalize_kernel, d=d, lane_pack=lane_pack, n_total=n,
        lambda_=float(lambda_), scale_loss=float(scale_loss), eps=float(eps))
    loss = pl.pallas_call(
        finalize,
        out_shape=jax.ShapeDtypeStruct((1, 1), jnp.float32),
        in_specs=[pl.BlockSpec(memory_space=pltpu.MemorySpace.VMEM),
                  pl.BlockSpec(memory_space=pltpu.MemorySpace.VMEM)],
        out_specs=pl.BlockSpec(memory_space=pltpu.MemorySpace.SMEM),
    )(vec_stats, cross)
    return loss[0, 0]


def _reference(embedding, lambda_, scale_loss, eps):
    x = embedding.astype(jnp.float32)
    n = x.shape[0]
    half = n // 2
    mean = jnp.mean(x, axis=0, keepdims=True)
    centered = x - mean
    var = jnp.mean(centered ** 2, axis=0, keepdims=True)
    normed = centered / jnp.sqrt(var + eps)
    a, b = normed[:half], normed[half:]
    corr = (a.T @ b) / float(half)
    on_diag = jnp.sum((jnp.diag(corr) - 1.0) ** 2) * scale_loss
    off = corr - jnp.diag(jnp.diag(corr))
    off_diag = jnp.sum(off ** 2) * scale_loss
    return on_diag + lambda_ * off_diag


if __name__ == "__main__":
    key = jax.random.PRNGKey(0)

    # Small config matching the module: N = 2 copies x 4 images, D = 32.
    emb_small = jax.random.normal(key, (8, EMBEDDING_DIM), dtype=jnp.float32)
    loss_small = barlow_twins_head(emb_small)
    jax.block_until_ready(loss_small)
    ref_small = _reference(emb_small, LAMBDA_, SCALE_LOSS, EPS)
    assert jnp.allclose(loss_small, ref_small, rtol=1e-3, atol=1e-4), (
        loss_small, ref_small)

    # Two-chunk ("parallel" leading axis) path, one block per chunk: N = 512.
    emb_mid = jax.random.normal(jax.random.PRNGKey(1), (512, EMBEDDING_DIM),
                                dtype=jnp.float32)
    loss_mid = barlow_twins_head(emb_mid)
    jax.block_until_ready(loss_mid)
    ref_mid = _reference(emb_mid, LAMBDA_, SCALE_LOSS, EPS)
    assert jnp.allclose(loss_mid, ref_mid, rtol=1e-3, atol=1e-4), (
        loss_mid, ref_mid)

    # Multi-step streaming accumulation (forced small blocks) + zero-padding
    # of an awkward half-batch: N = 360 -> half = 180 -> 45 packed rows.
    emb_odd = jax.random.normal(jax.random.PRNGKey(2), (360, EMBEDDING_DIM),
                                dtype=jnp.float32)
    loss_odd = barlow_twins_head(emb_odd, max_block_rows=8)
    jax.block_until_ready(loss_odd)
    ref_odd = _reference(emb_odd, LAMBDA_, SCALE_LOSS, EPS)
    assert jnp.allclose(loss_odd, ref_odd, rtol=1e-3, atol=1e-4), (
        loss_odd, ref_odd)

    print("KERNEL_OK")
</pallas_src>

<mosaic_0001>
module attributes {stable_mosaic.version = 11 : i64} {
  func.func @_stats_kernel(%arg0: i32, %arg1: i32, %arg2: memref<2x8x128xf32, #tpu.memory_space<vmem>>, %arg3: memref<1x8x128xf32, #tpu.memory_space<vmem>>, %arg4: memref<1x128x128xf32, #tpu.memory_space<vmem>>, %arg5: memref<8x128xf32, #tpu.memory_space<vmem>>, %arg6: memref<128x128xf32, #tpu.memory_space<vmem>>) attributes {dimension_semantics = [#tpu.dimension_semantics<parallel>, #tpu.dimension_semantics<arbitrary>], iteration_bounds = array<i64: 1, 1>, scalar_prefetch = 0 : i64, scratch_operands = 2 : i64, tpu.core_type = #tpu.core_type<tc>, window_params = [{transform_indices = @transform_0, window_bounds = array<i64: 2, 8, 128>}, {transform_indices = @transform_1, window_bounds = array<i64: 1, 8, 128>}, {transform_indices = @transform_2, window_bounds = array<i64: 1, 128, 128>}]} {
    %c0_i32 = arith.constant 0 : i32
    %0 = arith.cmpi eq, %arg1, %c0_i32 : i32
    %1 = arith.extui %0 : i1 to i32
    %c0_i32_0 = arith.constant 0 : i32
    %2 = arith.cmpi ne, %1, %c0_i32_0 : i32
    scf.if %2 {
      %cst_25 = arith.constant 0.000000e+00 : f32
      %32 = vector.broadcast %cst_25 : f32 to vector<8x128xf32>
      %c0_26 = arith.constant 0 : index
      %c0_27 = arith.constant 0 : index
      %33 = vector.load %arg5[%c0_26, %c0_27] : memref<8x128xf32, #tpu.memory_space<vmem>>, vector<8x128xf32>
      tpu.vector_store %arg5[%c0_26, %c0_27], %32 {strides = array<i32>} : memref<8x128xf32, #tpu.memory_space<vmem>>, vector<8x128xf32>,
      %cst_28 = arith.constant 0.000000e+00 : f32
      %34 = vector.broadcast %cst_28 : f32 to vector<128x128xf32>
      %c0_29 = arith.constant 0 : index
      %c0_30 = arith.constant 0 : index
      %35 = vector.load %arg6[%c0_29, %c0_30] : memref<128x128xf32, #tpu.memory_space<vmem>>, vector<128x128xf32>
      tpu.vector_store %arg6[%c0_29, %c0_30], %34 {strides = array<i32>} : memref<128x128xf32, #tpu.memory_space<vmem>>, vector<128x128xf32>,
    } else {
    }
    %c0 = arith.constant 0 : index
    %c0_1 = arith.constant 0 : index
    %c0_2 = arith.constant 0 : index
    %3 = vector.load %arg2[%c0, %c0_1, %c0_2] : memref<2x8x128xf32, #tpu.memory_space<vmem>>, vector<1x8x128xf32>
    %4 = vector.shape_cast %3 : vector<1x8x128xf32> to vector<8x128xf32>
    %c1 = arith.constant 1 : index
    %c0_3 = arith.constant 0 : index
    %c0_4 = arith.constant 0 : index
    %5 = vector.load %arg2[%c1, %c0_3, %c0_4] : memref<2x8x128xf32, #tpu.memory_space<vmem>>, vector<1x8x128xf32>
    %6 = vector.shape_cast %5 : vector<1x8x128xf32> to vector<8x128xf32>
    %c0_5 = arith.constant 0 : index
    %c0_6 = arith.constant 0 : index
    %7 = vector.load %arg5[%c0_5, %c0_6] : memref<8x128xf32, #tpu.memory_space<vmem>>, vector<1x128xf32>
    %cst = arith.constant dense<0.000000e+00> : vector<128xf32>
    %8 = vector.multi_reduction <add>, %4, %cst [0] : vector<8x128xf32> to vector<128xf32>
    %9 = vector.shape_cast %8 : vector<128xf32> to vector<1x128xf32>
    %10 = arith.addf %7, %9 : vector<1x128xf32>
    %c0_7 = arith.constant 0 : index
    %c0_8 = arith.constant 0 : index
    %11 = vector.load %arg5[%c0_7, %c0_8] : memref<8x128xf32, #tpu.memory_space<vmem>>, vector<1x128xf32>
    tpu.vector_store %arg5[%c0_7, %c0_8], %10 {strides = array<i32>} : memref<8x128xf32, #tpu.memory_space<vmem>>, vector<1x128xf32>,
    %c1_9 = arith.constant 1 : index
    %c0_10 = arith.constant 0 : index
    %12 = vector.load %arg5[%c1_9, %c0_10] : memref<8x128xf32, #tpu.memory_space<vmem>>, vector<1x128xf32>
    %cst_11 = arith.constant dense<0.000000e+00> : vector<128xf32>
    %13 = vector.multi_reduction <add>, %6, %cst_11 [0] : vector<8x128xf32> to vector<128xf32>
    %14 = vector.shape_cast %13 : vector<128xf32> to vector<1x128xf32>
    %15 = arith.addf %12, %14 : vector<1x128xf32>
    %c1_12 = arith.constant 1 : index
    %c0_13 = arith.constant 0 : index
    %16 = vector.load %arg5[%c1_12, %c0_13] : memref<8x128xf32, #tpu.memory_space<vmem>>, vector<1x128xf32>
    tpu.vector_store %arg5[%c1_12, %c0_13], %15 {strides = array<i32>} : memref<8x128xf32, #tpu.memory_space<vmem>>, vector<1x128xf32>,
    %c2 = arith.constant 2 : index
    %c0_14 = arith.constant 0 : index
    %17 = vector.load %arg5[%c2, %c0_14] : memref<8x128xf32, #tpu.memory_space<vmem>>, vector<1x128xf32>
    %18 = arith.mulf %4, %4 : vector<8x128xf32>
    %19 = arith.mulf %6, %6 : vector<8x128xf32>
    %20 = arith.addf %18, %19 : vector<8x128xf32>
    %cst_15 = arith.constant dense<0.000000e+00> : vector<128xf32>
    %21 = vector.multi_reduction <add>, %20, %cst_15 [0] : vector<8x128xf32> to vector<128xf32>
    %22 = vector.shape_cast %21 : vector<128xf32> to vector<1x128xf32>
    %23 = arith.addf %17, %22 : vector<1x128xf32>
    %c2_16 = arith.constant 2 : index
    %c0_17 = arith.constant 0 : index
    %24 = vector.load %arg5[%c2_16, %c0_17] : memref<8x128xf32, #tpu.memory_space<vmem>>, vector<1x128xf32>
    tpu.vector_store %arg5[%c2_16, %c0_17], %23 {strides = array<i32>} : memref<8x128xf32, #tpu.memory_space<vmem>>, vector<1x128xf32>,
    %c0_18 = arith.constant 0 : index
    %c0_19 = arith.constant 0 : index
    %25 = vector.load %arg6[%c0_18, %c0_19] : memref<128x128xf32, #tpu.memory_space<vmem>>, vector<128x128xf32>
    %cst_20 = arith.constant dense<0.000000e+00> : vector<128x128xf32>
    %26 = tpu.matmul %4, %6, %cst_20 {dimension_numbers = #tpu.dot_dimension_numbers<[0], [0], [1], [1], [0, 1, 1, 1], [], []>} : vector<8x128xf32>, vector<8x128xf32>, vector<128x128xf32> -> vector<128x128xf32>
    %27 = arith.addf %25, %26 : vector<128x128xf32>
    %c0_21 = arith.constant 0 : index
    %c0_22 = arith.constant 0 : index
    %28 = vector.load %arg6[%c0_21, %c0_22] : memref<128x128xf32, #tpu.memory_space<vmem>>, vector<128x128xf32>
    tpu.vector_store %arg6[%c0_21, %c0_22], %27 {strides = array<i32>} : memref<128x128xf32, #tpu.memory_space<vmem>>, vector<128x128xf32>,
    %c0_i32_23 = arith.constant 0 : i32
    %29 = arith.cmpi eq, %arg1, %c0_i32_23 : i32
    %30 = arith.extui %29 : i1 to i32
    %c0_i32_24 = arith.constant 0 : i32
    %31 = arith.cmpi ne, %30, %c0_i32_24 : i32
    scf.if %31 {
      %c0_25 = arith.constant 0 : index
      %c0_26 = arith.constant 0 : index
      %32 = vector.load %arg5[%c0_25, %c0_26] : memref<8x128xf32, #tpu.memory_space<vmem>>, vector<8x128xf32>
      %c0_27 = arith.constant 0 : index
      %c0_28 = arith.constant 0 : index
      %c0_29 = arith.constant 0 : index
      %33 = vector.load %arg3[%c0_27, %c0_28, %c0_29] : memref<1x8x128xf32, #tpu.memory_space<vmem>>, vector<1x8x128xf32>
      %34 = vector.shape_cast %33 : vector<1x8x128xf32> to vector<8x128xf32>
      %35 = vector.shape_cast %32 : vector<8x128xf32> to vector<1x8x128xf32>
      tpu.vector_store %arg3[%c0_27, %c0_28, %c0_29], %35 {strides = array<i32>} : memref<1x8x128xf32, #tpu.memory_space<vmem>>, vector<1x8x128xf32>,
      %c0_30 = arith.constant 0 : index
      %c0_31 = arith.constant 0 : index
      %36 = vector.load %arg6[%c0_30, %c0_31] : memref<128x128xf32, #tpu.memory_space<vmem>>, vector<128x128xf32>
      %c0_32 = arith.constant 0 : index
      %c0_33 = arith.constant 0 : index
      %c0_34 = arith.constant 0 : index
      %37 = vector.load %arg4[%c0_32, %c0_33, %c0_34] : memref<1x128x128xf32, #tpu.memory_space<vmem>>, vector<1x128x128xf32>
      %38 = vector.shape_cast %37 : vector<1x128x128xf32> to vector<128x128xf32>
      %39 = vector.shape_cast %36 : vector<128x128xf32> to vector<1x128x128xf32>
      tpu.vector_store %arg4[%c0_32, %c0_33, %c0_34], %39 {strides = array<i32>} : memref<1x128x128xf32, #tpu.memory_space<vmem>>, vector<1x128x128xf32>,
    } else {
    }
    return
  }
  func.func @transform_0(%arg0: i32, %arg1: i32) -> (i32, i32, i32) {
    %c1_i32 = arith.constant 1 : i32
    %0 = arith.muli %arg0, %c1_i32 : i32
    %1 = arith.addi %0, %arg1 : i32
    %c0_i32 = arith.constant 0 : i32
    %c0_i32_0 = arith.constant 0 : i32
    %c0_i32_1 = arith.constant 0 : i32
    return %c0_i32, %1, %c0_i32_0 : i32, i32, i32
  }
  func.func @transform_1(%arg0: i32, %arg1: i32) -> (i32, i32, i32) {
    %c0_i32 = arith.constant 0 : i32
    %c0_i32_0 = arith.constant 0 : i32
    %c0_i32_1 = arith.constant 0 : i32
    return %arg0, %c0_i32, %c0_i32_0 : i32, i32, i32
  }
  func.func @transform_2(%arg0: i32, %arg1: i32) -> (i32, i32, i32) {
    %c0_i32 = arith.constant 0 : i32
    %c0_i32_0 = arith.constant 0 : i32
    %c0_i32_1 = arith.constant 0 : i32
    return %arg0, %c0_i32, %c0_i32_0 : i32, i32, i32
  }
}

</mosaic_0001>

<bundles_post_ra>
// kernel: tpu_custom_call.1
= control target key start
LH: loop header
LB: loop body
LE: loop exit
PB: predicated region body
PF: predicated region fallthrough
CT: control target
= control target key end

     0   :  { %8 = vsyncpa [#allocation5], 0  ;;  %s644_s0 = inlined_call_operand.hbm [shape: f32[2,8,128], index: 0, kind: input, shape index: {}]   ;;  %s645_s1 = inlined_call_operand.hbm [shape: f32[1,8,128], index: 1, kind: output, shape index: {0}]   ;;  %s646_s2 = inlined_call_operand.hbm [shape: f32[1,128,128], index: 2, kind: output, shape index: {1}]  }
   0x1   :  { %9 = vsyncpa [#allocation6], 0 }
   0x2   :  { %10 = vsyncpa [#allocation9], 0  ;;  %s565_s9 = smov [#allocation4]   ;;  %s493_s13 = scalar_lea.hbm %s644_s0, 256 }
   0x3   :  { %s19_s10 = sshll.u32 %s565_s9, 4  ;;  %p494_p0 = scmp.ne.s32.totalorder %s644_s0, %s493_s13  ;;  %s20_s10 = int_to_ptr.vmem [resolvable:$true] %s19_s10 }
   0x4   :  { %p497_p1 = scmp.lt.u32.totalorder %s493_s13, %s644_s0 }
   0x6   :  { %p499_p2 = pnand %p497_p1, %p494_p0 }
   0x8   :  { %502 = shalt.err (!%p499_p2)
}
   0x9   :  { %s503_s18 = scalar_lea.vmem %s20_s10, 256  ;;  %p508_p4 = scmp.lt.s32.totalorder %s20_s10, %s20_s10 }
   0xa   :  { %p504_p3 = scmp.ne.s32.totalorder %s20_s10, %s503_s18  ;;  %p509_p5 = scmp.lt.s32.totalorder %s503_s18, %s503_s18 }
   0xc   :  { %p510_p6 = por %p509_p5, %p508_p4 }
   0xe   :  { %p511_p7 = pnand %p510_p6, %p504_p3 }
  0x10   :  { %514 = shalt.err (!%p511_p7)
}
  0x11   :  { %s566_s19 = smov 128   ;;  %s567_s20 = smov 8  }
  0x12   :  { %25 = dma.hbm_to_vmem [thread:$0]  %s644_s0, 256, %s20_s10, [#allocation5], %s566_s19, %s566_s19, %s567_s20  }
  0x13   :  { %559 = dma.done.wait [#allocation5], 256  }
  0x14   :  { %560 = vsyncadd [#allocation5], 4294967040  ;;  %v568_v0 = vmov 0.0   ;;  %v51_v1 = vld [vmem:[#allocation4] sm:$0xff]  ;;  %v53_v2 = vld [vmem:[#allocation4 + $0x8] sm:$0xff]  ;;  %vm132_vm0 = vcmask 64512  }
  0x15   :  { %34 = vst [vmem:[#allocation2] sm:$0xff] %v568_v0  ;;  %v74_v3 = vmul.f32 %v53_v2, %v53_v2  ;;  %100 = vxpose.xlu0.b32.start.end [1/1] (short) %v51_v1, 128  ;;  %v55_v4 = vrot.slane %v51_v1, 4  ;;  %v73_v5 = vmul.f32 %v51_v1, %v51_v1  ;;  %459 = vmatprep.subr.mxu0 %v53_v2  ;;  %v64_v38 = vrot.slane %v53_v2, 4  ;;  %s569_s0 = smov [#allocation7]  }
  0x16   :  { %460 = vmatpush3.msra.mxu0 %v53_v2  ;;  %485 = vmatprep.subr.mxu1 %v53_v2  ;;  %s401_s23 = sshll.u32 %s569_s0, 4  ;;  %s402_s23 = int_to_ptr.vmem [resolvable:$true] %s401_s23 }
  0x17   :  { %v56_v6 = vadd.f32 %v55_v4, %v51_v1  ;;  %v75_v7 = vadd.f32 %v74_v3, %v73_v5  ;;  %486 = vmatpush3.msra.mxu1 %v53_v2  ;;  %v65_v39 = vadd.f32 %v64_v38, %v53_v2  ;;  %s515_s24 = scalar_lea.vmem %s402_s23, 128  ;;  %p520_p9 = scmp.lt.s32.totalorder %s402_s23, %s402_s23 }
  0x18   :  { %p516_p8 = scmp.ne.s32.totalorder %s402_s23, %s515_s24  ;;  %p521_p10 = scmp.lt.s32.totalorder %s515_s24, %s515_s24 }
  0x19   :  { %v57_v8 = vrot.slane %v56_v6, 2  ;;  %v76_v9 = vrot.slane %v75_v7, 4  ;;  %v66_v40 = vrot.slane %v65_v39, 2 }
  0x1a   :  { %p522_p11 = por %p521_p10, %p520_p9 }
  0x1b   :  { %v58_v10 = vadd.f32 %v57_v8, %v56_v6  ;;  %v77_v11 = vadd.f32 %v76_v9, %v75_v7  ;;  %v67_v41 = vadd.f32 %v66_v40, %v65_v39 }
  0x1c   :  { %v54_v14 = vld [vmem:[#allocation2] sm:$0x1]  ;;  %v72_v19 = vld [vmem:[#allocation2 + $0x2] sm:$0x1]  ;;  %v63_v44 = vld [vmem:[#allocation2 + $0x1] sm:$0x1]  ;;  %p523_p12 = pnand %p522_p11, %p516_p8 }
  0x1d   :  { %v59_v12 = vrot.slane %v58_v10, 1  ;;  %v78_v13 = vrot.slane %v77_v11, 2  ;;  %v68_v42 = vrot.slane %v67_v41, 1 }
  0x1f   :  { %v60_v15 = vadd.f32 %v59_v12, %v58_v10  ;;  %v79_v16 = vadd.f32 %v78_v13, %v77_v11  ;;  %v69_v43 = vadd.f32 %v68_v42, %v67_v41 }
  0x21   :  { %v61_v17 = vadd.f32 %v60_v15, %v54_v14  ;;  %v80_v18 = vrot.slane %v79_v16, 1  ;;  %v70_v45 = vadd.f32 %v69_v43, %v63_v44 }
  0x23   :  { %62 = vst [vmem:[#allocation2] sm:$0x1] %v61_v17  ;;  %v81_v20 = vadd.f32 %v80_v18, %v79_v16  ;;  %71 = vst [vmem:[#allocation2 + $0x1] sm:$0x1] %v70_v45 }
  0x25   :  { %v82_v21 = vadd.f32 %v81_v20, %v72_v19 }
  0x27   :  { %83 = vst [vmem:[#allocation2 + $0x2] sm:$0x1] %v82_v21 }
  0x2e   :  { %v361_v46 = vld [vmem:[#allocation2] sm:$0xff] }
  0x2f   :  { %362 = vst [vmem:[#allocation7] sm:$0xff] %v361_v46 }
  0x95   :  { %v116_v22 = vpop.trf.xlu0 }
  0x96   :  { %461 = vmatprep.mubr.msk.f32.mxu0 %vm132_vm0, %v116_v22 }
  0x99   :  { %v117_v23 = vpop.trf.xlu0 }
  0x9a   :  { %462 = vmatmul.mubr.msk.f32.vlgmr.msra.gmra.mrb[0].mxu0 %vm132_vm0, %v117_v23 }
  0x9d   :  { %v118_v24 = vpop.trf.xlu0 }
  0x9e   :  { %464 = vmatprep.mubr.msk.f32.mxu0 %vm132_vm0, %v118_v24 }
  0xa1   :  { %v119_v25 = vpop.trf.xlu0 }
  0xa2   :  { %465 = vmatmul.mubr.msk.f32.gmra.mrb[2].mxu0 %vm132_vm0, %v119_v25 }
  0xa5   :  { %v120_v26 = vpop.trf.xlu0 }
  0xa6   :  { %467 = vmatprep.mubr.msk.f32.mxu0 %vm132_vm0, %v120_v26 }
  0xa9   :  { %v121_v27 = vpop.trf.xlu0 }
  0xaa   :  { %468 = vmatmul.mubr.msk.f32.gmra.mrb[4].mxu0 %vm132_vm0, %v121_v27 }
  0xad   :  { %v122_v28 = vpop.trf.xlu0 }
  0xae   :  { %470 = vmatprep.mubr.msk.f32.mxu0 %vm132_vm0, %v122_v28 }
  0xb1   :  { %v123_v29 = vpop.trf.xlu0 }
  0xb2   :  { %471 = vmatmul.mubr.msk.f32.gmra.mrb[6].mxu0 %vm132_vm0, %v123_v29 }
  0xb5   :  { %v124_v30 = vpop.trf.xlu0 }
  0xb6   :  { %473 = vmatprep.mubr.msk.f32.mxu1 %vm132_vm0, %v124_v30 }
  0xb9   :  { %v125_v31 = vpop.trf.xlu0 }
  0xba   :  { %474 = vmatmul.mubr.msk.f32.vlgmr.msra.gmra.mrb[0].mxu1 %vm132_vm0, %v125_v31 }
  0xbd   :  { %v126_v32 = vpop.trf.xlu0 }
  0xbe   :  { %476 = vmatprep.mubr.msk.f32.mxu1 %vm132_vm0, %v126_v32 }
  0xc1   :  { %v127_v33 = vpop.trf.xlu0 }
  0xc2   :  { %477 = vmatmul.mubr.msk.f32.gmra.mrb[2].mxu1 %vm132_vm0, %v127_v33 }
  0xc5   :  { %v128_v34 = vpop.trf.xlu0 }
  0xc6   :  { %479 = vmatprep.mubr.msk.f32.mxu1 %vm132_vm0, %v128_v34 }
  0xc9   :  { %v129_v35 = vpop.trf.xlu0 }
  0xca   :  { %480 = vmatmul.mubr.msk.f32.gmra.mrb[4].mxu1 %vm132_vm0, %v129_v35 }
  0xcd   :  { %v130_v36 = vpop.trf.xlu0 }
  0xce   :  { %482 = vmatprep.mubr.msk.f32.mxu1 %vm132_vm0, %v130_v36 }
  0xd1   :  { %v131_v37 = vpop.trf.xlu0 }
  0xd2   :  { %483 = vmatmul.mubr.msk.f32.gmra.mrb[6].mxu1 %vm132_vm0, %v131_v37 }
  0xd3   :  { %526 = shalt.err (!%p523_p12)
}
  0xd4   :  { %s527_s27 = scalar_lea.hbm %s645_s1, 128 }
  0xd5   :  { %p528_p13 = scmp.ne.s32.totalorder %s645_s1, %s527_s27  ;;  %p531_p0 = scmp.lt.u32.totalorder %s527_s27, %s645_s1 }
  0xd7   :  { %p533_p1 = pnand %p531_p0, %p528_p13 }
  0xd9   :  { %536 = shalt.err (!%p533_p1)
}
  0xda   :  { %404 = dma.vmem_to_hbm [thread:$0]  %s402_s23, 128, %s645_s1, [#allocation6]  }
  0xdb   :  { %s570_s1 = smov [#allocation8]  }
  0xdc   :  { %s410_s6 = sshll.u32 %s570_s1, 4  ;;  %s411_s6 = int_to_ptr.vmem [resolvable:$true] %s410_s6 }
  0xdd   :  { %s537_s7 = scalar_lea.vmem %s411_s6, 2048  ;;  %p542_p3 = scmp.lt.s32.totalorder %s411_s6, %s411_s6 }
  0xde   :  { %p538_p2 = scmp.ne.s32.totalorder %s411_s6, %s537_s7  ;;  %p543_p4 = scmp.lt.s32.totalorder %s537_s7, %s537_s7 }
  0xe0   :  { %p544_p5 = por %p543_p4, %p542_p3 }
  0xe2   :  { %p545_p6 = pnand %p544_p5, %p538_p2 }
 0x16d   :  { %v463_v47 = vpop.f32.mrb[0].mxu0 }
 0x16e   :  { %380 = vst [vmem:[#allocation8 + $0x8] sm:$0xff] %v463_v47  ;;  %v247_v48 = vpop.f32.mrb[1].mxu0 }
 0x16f   :  { %379 = vst [vmem:[#allocation8] sm:$0xff] %v247_v48 }
 0x175   :  { %v466_v49 = vpop.f32.mrb[2].mxu0 }
 0x176   :  { %382 = vst [vmem:[#allocation8 + $0x18] sm:$0xff] %v466_v49  ;;  %v257_v50 = vpop.f32.mrb[3].mxu0 }
 0x177   :  { %381 = vst [vmem:[#allocation8 + $0x10] sm:$0xff] %v257_v50 }
 0x17d   :  { %v469_v51 = vpop.f32.mrb[4].mxu0 }
 0x17e   :  { %384 = vst [vmem:[#allocation8 + $0x28] sm:$0xff] %v469_v51  ;;  %v267_v52 = vpop.f32.mrb[5].mxu0 }
 0x17f   :  { %383 = vst [vmem:[#allocation8 + $0x20] sm:$0xff] %v267_v52 }
 0x185   :  { %v472_v53 = vpop.f32.mrb[6].mxu0 }
 0x186   :  { %386 = vst [vmem:[#allocation8 + $0x38] sm:$0xff] %v472_v53  ;;  %v277_v54 = vpop.f32.mrb[7].mxu0 }
 0x187   :  { %385 = vst [vmem:[#allocation8 + $0x30] sm:$0xff] %v277_v54 }
 0x18d   :  { %v475_v55 = vpop.f32.mrb[0].mxu1 }
 0x18e   :  { %388 = vst [vmem:[#allocation8 + $0x48] sm:$0xff] %v475_v55  ;;  %v287_v56 = vpop.f32.mrb[1].mxu1 }
 0x18f   :  { %387 = vst [vmem:[#allocation8 + $0x40] sm:$0xff] %v287_v56 }
 0x195   :  { %v478_v57 = vpop.f32.mrb[2].mxu1 }
 0x196   :  { %390 = vst [vmem:[#allocation8 + $0x58] sm:$0xff] %v478_v57  ;;  %v297_v58 = vpop.f32.mrb[3].mxu1 }
 0x197   :  { %389 = vst [vmem:[#allocation8 + $0x50] sm:$0xff] %v297_v58 }
 0x19d   :  { %v481_v59 = vpop.f32.mrb[4].mxu1 }
 0x19e   :  { %392 = vst [vmem:[#allocation8 + $0x68] sm:$0xff] %v481_v59  ;;  %v307_v60 = vpop.f32.mrb[5].mxu1 }
 0x19f   :  { %391 = vst [vmem:[#allocation8 + $0x60] sm:$0xff] %v307_v60 }
 0x1a5   :  { %v484_v61 = vpop.f32.mrb[6].mxu1 }
 0x1a6   :  { %394 = vst [vmem:[#allocation8 + $0x78] sm:$0xff] %v484_v61  ;;  %v317_v62 = vpop.f32.mrb[7].mxu1 }
 0x1a7   :  { %393 = vst [vmem:[#allocation8 + $0x70] sm:$0xff] %v317_v62 }
 0x1a8   :  { %548 = shalt.err (!%p545_p6)
}
 0x1a9   :  { %s549_s10 = scalar_lea.hbm %s646_s2, 2048 }
 0x1aa   :  { %p550_p7 = scmp.ne.s32.totalorder %s646_s2, %s549_s10  ;;  %p553_p8 = scmp.lt.u32.totalorder %s549_s10, %s646_s2 }
 0x1ac   :  { %p555_p9 = pnand %p553_p8, %p550_p7 }
 0x1ae   :  { %558 = shalt.err (!%p555_p9)
}
 0x1af   :  { %416 = dma.vmem_to_hbm [thread:$0]  %s411_s6, 2048, %s646_s2, [#allocation9], %s566_s19, %s566_s19, %s567_s20  }
 0x1b0   :  { %561 = dma.done.wait [#allocation6], 128  }
 0x1b1   :  { %562 = vsyncadd [#allocation6], 4294967168 }
 0x1b2   :  { %563 = dma.done.wait [#allocation9], 2048  }
 0x1b3   :  { %564 = vsyncadd [#allocation9], 4294965248 }
 0x1b4   :  { %423 = vsyncpa [#allocation5], 1 }
 0x1b5   :  { %424 = vsyncpa [#allocation6], 1 }
 0x1b6   :  { %425 = vsyncpa [#allocation9], 1 }

</bundles_post_ra>
